<compile_context>
chip_gen: v6e
topology: v6e:2x2x1
jax: 0.10.0
libtpu: 0.0.40
codegen_flags: <defaults>
</compile_context>

<pallas_src>
import jax
import jax.numpy as jnp
from jax import lax
from jax.experimental import pallas as pl
from jax.experimental.pallas import tpu as pltpu

DIM = 16            # self.dim
NEG_SLOPE = 0.2     # LeakyReLU negative_slope
INIT_W = 0.1        # self.initial_weight (uniform init range)
MAX_TILE_M = 512    # lanes per grid step (multiple of 128); comfortable on v5e/v6e/v7x


def _round_up(x, m):
    return ((x + m - 1) // m) * m


def _choose_tile_m(m):
    """Lane tile: multiple of 128, at most MAX_TILE_M, no larger than needed."""
    return min(MAX_TILE_M, _round_up(m, 128))


# ------------------------------ Pallas kernels ------------------------------ #
def _conv_gemm_leaky_kernel(w_ref, x_ref, b_ref, o_ref):
    # w: [Cout, K] bf16, x: [K, TILE_M] bf16, b: [Cout, 1] f32 -> o: [Cout, TILE_M] bf16
    acc = jnp.dot(w_ref[...], x_ref[...], preferred_element_type=jnp.float32)
    acc = acc + b_ref[...]                                   # broadcast over lanes
    acc = jnp.where(acc >= 0.0, acc, NEG_SLOPE * acc)        # LeakyReLU(0.2), f32
    o_ref[...] = acc.astype(o_ref.dtype)                     # lane-dense store


def _conv3_linear_fused_kernel(w_ref, x_ref, b_ref, wl_ref, o_ref):
    # conv3 GEMM + bias + LeakyReLU, then per-position weighted channel sum with
    # the (C,H,W)-ordered Linear weight -> only [1, TILE_M] partial sums leave VMEM.
    acc = jnp.dot(w_ref[...], x_ref[...], preferred_element_type=jnp.float32)
    acc = acc + b_ref[...]
    h = jnp.where(acc >= 0.0, acc, NEG_SLOPE * acc)          # [Cout, TILE_M] f32
    o_ref[...] = jnp.sum(h * wl_ref[...], axis=0, keepdims=True)   # [1, TILE_M]


def _gemm_pallas_call(kernel_fn, w2d, cols, bias_col, extra_inputs,
                      out_rows, out_dtype, tile):
    """out[out_rows, M_pad] = kernel(W, cols, bias, *extra); grid over M tiles."""
    n_out, k_dim = w2d.shape
    m_pad = cols.shape[1]
    grid = (m_pad // tile,)
    in_specs = [
        pl.BlockSpec((n_out, k_dim), lambda i: (0, 0)),   # weights: VMEM-resident
        pl.BlockSpec((k_dim, tile), lambda i: (0, i)),    # cols: tiled over M (lanes)
        pl.BlockSpec((n_out, 1), lambda i: (0, 0)),       # bias: resident
    ]
    args = [w2d, cols, bias_col]
    for arr in extra_inputs:
        in_specs.append(pl.BlockSpec(arr.shape, lambda i: (0, 0)))
        args.append(arr)
    bytes_accessed = int(sum(a.size * a.dtype.itemsize for a in args)
                         + out_rows * m_pad * jnp.dtype(out_dtype).itemsize)
    cost = pl.CostEstimate(flops=2 * n_out * k_dim * m_pad,
                           transcendentals=0,
                           bytes_accessed=bytes_accessed)
    return pl.pallas_call(
        kernel_fn,
        out_shape=jax.ShapeDtypeStruct((out_rows, m_pad), out_dtype),
        grid=grid,
        in_specs=in_specs,
        out_specs=pl.BlockSpec((out_rows, tile), lambda i: (0, i)),
        compiler_params=pltpu.CompilerParams(
            dimension_semantics=("parallel",),
            vmem_limit_bytes=48 * 1024 * 1024),
        cost_estimate=cost,
    )(*args)


# -------------------------------- glue (JAX) -------------------------------- #
def _im2col_cm(x_cbhw, k=5, stride=2, pad=2):
    """Channel-major im2col.

    x: [C, B, H, W] -> cols [C*k*k, B*Ho*Wo]; rows ordered (c, kh, kw) to match
    w.reshape(Cout, Cin*k*k); columns ordered (b, oh, ow)."""
    C, B, H, W = x_cbhw.shape
    xp = jnp.pad(x_cbhw, ((0, 0), (0, 0), (pad, pad), (pad, pad)))
    Ho = (H + 2 * pad - k) // stride + 1
    Wo = (W + 2 * pad - k) // stride + 1
    patches = []
    for kh in range(k):
        for kw in range(k):
            patches.append(
                xp[:, :, kh:kh + stride * Ho:stride, kw:kw + stride * Wo:stride])
    col = jnp.stack(patches, axis=1)                 # [C, k*k, B, Ho, Wo]
    return col.reshape(C * k * k, B * Ho * Wo), Ho, Wo


def conv_leaky(x_cbhw, w_oihw, b):
    """Conv2d(k=5, s=2, p=2) + LeakyReLU(0.2) as a transposed, M-gridded GEMM."""
    Cout, Cin, k, _ = w_oihw.shape
    C, B, H, W = x_cbhw.shape
    assert C == Cin
    cols, Ho, Wo = _im2col_cm(x_cbhw, k=k)           # [Cin*k*k, B*Ho*Wo] bf16
    M = B * Ho * Wo
    tile = _choose_tile_m(M)
    M_pad = _round_up(M, tile)
    if M_pad != M:
        cols = jnp.pad(cols, ((0, 0), (0, M_pad - M)))
    w2d = w_oihw.reshape(Cout, Cin * k * k).astype(jnp.bfloat16)
    bias = b.reshape(Cout, 1).astype(jnp.float32)
    y = _gemm_pallas_call(_conv_gemm_leaky_kernel, w2d, cols, bias, (),
                          Cout, jnp.bfloat16, tile)
    return y[:, :M].reshape(Cout, B, Ho, Wo)         # already channel-major


def conv3_linear_sigmoid(x_cbhw, w_oihw, b, wl, bl):
    """Fused conv3 + LeakyReLU + flatten + Linear(1024->1); sigmoid on [B] logits."""
    Cout, Cin, k, _ = w_oihw.shape
    C, B, H, W = x_cbhw.shape
    assert C == Cin
    cols, Ho, Wo = _im2col_cm(x_cbhw, k=k)           # [Cin*k*k, B*16] bf16
    M = B * Ho * Wo
    tile = _choose_tile_m(M)                         # multiple of 128 -> multiple of 16
    M_pad = _round_up(M, tile)
    if M_pad != M:
        cols = jnp.pad(cols, ((0, 0), (0, M_pad - M)))
    w2d = w_oihw.reshape(Cout, Cin * k * k).astype(jnp.bfloat16)
    bias = b.reshape(Cout, 1).astype(jnp.float32)
    # Linear weight in PyTorch flatten order (C, H, W), tiled to the lane width so
    # column m of every tile sees wl[:, m % (Ho*Wo)] (tiles start at m % 16 == 0).
    wl_chw = wl.reshape(Cout, Ho * Wo).astype(jnp.float32)          # [64, 16]
    wl_tile = jnp.tile(wl_chw, (1, tile // (Ho * Wo)))              # [64, tile]
    part = _gemm_pallas_call(_conv3_linear_fused_kernel, w2d, cols, bias,
                             (wl_tile,), 1, jnp.float32, tile)      # [1, M_pad]
    # TODO(synk): the final per-example 16-way spatial reduction + bias + sigmoid
    # (O(B) floats) finishes in plain JAX — a lane-group reduce to a <128-wide
    # output block has no clean (8,128)-aligned out_spec.
    logits = part[0, :M].reshape(B, Ho * Wo).sum(axis=-1) + bl.reshape(())
    return jax.nn.sigmoid(logits)


def init_params(key, dim=DIM, init_w=INIT_W):
    keys = jax.random.split(key, 8)
    u = lambda kk, shape: jax.random.uniform(kk, shape, jnp.float32, -init_w, init_w)
    return {
        "w1": u(keys[0], (dim, 1, 5, 5)),            "b1": u(keys[1], (dim,)),
        "w2": u(keys[2], (2 * dim, dim, 5, 5)),      "b2": u(keys[3], (2 * dim,)),
        "w3": u(keys[4], (4 * dim, 2 * dim, 5, 5)),  "b3": u(keys[5], (4 * dim,)),
        "wl": u(keys[6], (1, 4 * 4 * 4 * dim)),      "bl": u(keys[7], (1,)),
    }


def discriminator_forward(params, x):
    B = x.size // (1 * 28 * 28)
    x = x.reshape(B, 1, 28, 28)                                # input.view(-1,1,28,28)
    h = jnp.transpose(x, (1, 0, 2, 3)).astype(jnp.bfloat16)    # channel-major [1,B,28,28]
    h = conv_leaky(h, params["w1"], params["b1"])              # [16, B, 14, 14] bf16
    h = conv_leaky(h, params["w2"], params["b2"])              # [32, B, 7, 7]   bf16
    out = conv3_linear_sigmoid(h, params["w3"], params["b3"],
                               params["wl"], params["bl"])     # [B] f32
    return out                                                 # == out.view(-1)


# ----------------------------- JAX references ------------------------------- #
def reference_forward_f32(params, x):
    """Pure-f32 reference of the PyTorch module."""
    B = x.size // 784
    x = x.reshape(B, 1, 28, 28)

    def conv(h, w, b):
        y = lax.conv_general_dilated(
            h, w, window_strides=(2, 2), padding=((2, 2), (2, 2)),
            dimension_numbers=("NCHW", "OIHW", "NCHW"))
        y = y + b.reshape(1, -1, 1, 1)
        return jnp.where(y >= 0, y, NEG_SLOPE * y)

    h = conv(x, params["w1"], params["b1"])
    h = conv(h, params["w2"], params["b2"])
    h = conv(h, params["w3"], params["b3"])
    flat = h.reshape(B, -1)
    logit = flat @ params["wl"].T + params["bl"]
    return jax.nn.sigmoid(logit).reshape(-1)


def reference_forward_bf16ops(params, x):
    """Reference mirroring the kernel arithmetic: bf16 matmul operands, f32 accumulate,
    f32 bias/LeakyReLU, bf16 inter-layer activations, f32 final linear."""
    B = x.size // 784
    x = x.reshape(B, 1, 28, 28)

    def conv(h_bf16, w, b):
        y = lax.conv_general_dilated(
            h_bf16, w.astype(jnp.bfloat16), window_strides=(2, 2),
            padding=((2, 2), (2, 2)),
            dimension_numbers=("NCHW", "OIHW", "NCHW"),
            preferred_element_type=jnp.float32)
        y = y + b.reshape(1, -1, 1, 1)
        return jnp.where(y >= 0, y, NEG_SLOPE * y)

    h1 = conv(x.astype(jnp.bfloat16), params["w1"], params["b1"]).astype(jnp.bfloat16)
    h2 = conv(h1, params["w2"], params["b2"]).astype(jnp.bfloat16)
    h3 = conv(h2, params["w3"], params["b3"])                   # f32
    flat = h3.reshape(B, -1)
    logit = flat @ params["wl"].T + params["bl"]
    return jax.nn.sigmoid(logit).reshape(-1)


if __name__ == "__main__":
    key = jax.random.PRNGKey(0)
    pkey, xkey = jax.random.split(key)
    params = init_params(pkey)

    B = 2
    x = jax.random.normal(xkey, (B, 1, 28, 28), dtype=jnp.float32)

    fwd = jax.jit(discriminator_forward)
    out = jax.block_until_ready(fwd(params, x))

    ref_bf16 = jax.block_until_ready(reference_forward_bf16ops(params, x))
    ref_f32 = jax.block_until_ready(reference_forward_f32(params, x))

    assert out.shape == (B,), out.shape
    # Tight check against the reference with matched bf16-operand / f32-accumulate math.
    assert jnp.allclose(out, ref_bf16, atol=2e-3, rtol=2e-3), (out, ref_bf16)
    # Loose end-to-end sanity check vs the pure-f32 module (bf16 rounding headroom).
    assert jnp.allclose(out, ref_f32, atol=2e-2, rtol=2e-2), (out, ref_f32)

    print("KERNEL_OK")
</pallas_src>

<mosaic_0001>
module attributes {stable_mosaic.version = 11 : i64} {
  func.func @_conv_gemm_leaky_kernel(%arg0: i32, %arg1: memref<16x25xbf16, #tpu.memory_space<vmem>>, %arg2: memref<25x512xbf16, #tpu.memory_space<vmem>>, %arg3: memref<16x1xf32, #tpu.memory_space<vmem>>, %arg4: memref<16x512xbf16, #tpu.memory_space<vmem>>) attributes {dimension_semantics = [#tpu.dimension_semantics<parallel>], iteration_bounds = array<i64: 1>, scalar_prefetch = 0 : i64, scratch_operands = 0 : i64, tpu.core_type = #tpu.core_type<tc>, window_params = [{pipeline_mode = #tpu.pipeline_mode<synchronous>, transform_indices = @transform_0, window_bounds = array<i64: 16, 25>}, {transform_indices = @transform_1, window_bounds = array<i64: 25, 512>}, {pipeline_mode = #tpu.pipeline_mode<synchronous>, transform_indices = @transform_2, window_bounds = array<i64: 16, 1>}, {transform_indices = @transform_3, window_bounds = array<i64: 16, 512>}]} {
    %c0 = arith.constant 0 : index
    %c0_0 = arith.constant 0 : index
    %0 = vector.load %arg1[%c0, %c0_0] : memref<16x25xbf16, #tpu.memory_space<vmem>>, vector<16x25xbf16>
    %c0_1 = arith.constant 0 : index
    %c0_2 = arith.constant 0 : index
    %1 = vector.load %arg2[%c0_1, %c0_2] : memref<25x512xbf16, #tpu.memory_space<vmem>>, vector<25x512xbf16>
    %cst = arith.constant dense<0.000000e+00> : vector<16x512xf32>
    %2 = tpu.matmul %0, %1, %cst {dimension_numbers = #tpu.dot_dimension_numbers<[1], [0], [0], [1], [0, 0, 1, 1], [], []>} : vector<16x25xbf16>, vector<25x512xbf16>, vector<16x512xf32> -> vector<16x512xf32>
    %c0_3 = arith.constant 0 : index
    %c0_4 = arith.constant 0 : index
    %3 = vector.load %arg3[%c0_3, %c0_4] : memref<16x1xf32, #tpu.memory_space<vmem>>, vector<16x1xf32>
    %4 = vector.broadcast %3 : vector<16x1xf32> to vector<16x512xf32>
    %5 = arith.addf %2, %4 : vector<16x512xf32>
    %cst_5 = arith.constant 0.000000e+00 : f32
    %6 = vector.broadcast %cst_5 : f32 to vector<16x512xf32>
    %7 = arith.cmpf oge, %5, %6 : vector<16x512xf32>
    %cst_6 = arith.constant 2.000000e-01 : f32
    %8 = vector.broadcast %cst_6 : f32 to vector<16x512xf32>
    %9 = arith.mulf %8, %5 : vector<16x512xf32>
    %10 = arith.select %7, %5, %9 : vector<16x512xi1>, vector<16x512xf32>
    %11 = arith.truncf %10 : vector<16x512xf32> to vector<16x512xbf16>
    %c0_7 = arith.constant 0 : index
    %c0_8 = arith.constant 0 : index
    %12 = vector.load %arg4[%c0_7, %c0_8] : memref<16x512xbf16, #tpu.memory_space<vmem>>, vector<16x512xbf16>
    tpu.vector_store %arg4[%c0_7, %c0_8], %11 {strides = array<i32>} : memref<16x512xbf16, #tpu.memory_space<vmem>>, vector<16x512xbf16>,
    return
  }
  func.func @transform_0(%arg0: i32) -> (i32, i32) {
    %c0_i32 = arith.constant 0 : i32
    %c0_i32_0 = arith.constant 0 : i32
    %c0_i32_1 = arith.constant 0 : i32
    return %c0_i32, %c0_i32_0 : i32, i32
  }
  func.func @transform_1(%arg0: i32) -> (i32, i32) {
    %c0_i32 = arith.constant 0 : i32
    %c0_i32_0 = arith.constant 0 : i32
    return %c0_i32, %arg0 : i32, i32
  }
  func.func @transform_2(%arg0: i32) -> (i32, i32) {
    %c0_i32 = arith.constant 0 : i32
    %c0_i32_0 = arith.constant 0 : i32
    %c0_i32_1 = arith.constant 0 : i32
    return %c0_i32, %c0_i32_0 : i32, i32
  }
  func.func @transform_3(%arg0: i32) -> (i32, i32) {
    %c0_i32 = arith.constant 0 : i32
    %c0_i32_0 = arith.constant 0 : i32
    return %c0_i32, %arg0 : i32, i32
  }
}

module attributes {stable_mosaic.version = 11 : i64} {
  func.func @_conv_gemm_leaky_kernel(%arg0: i32, %arg1: memref<32x400xbf16, #tpu.memory_space<vmem>>, %arg2: memref<400x128xbf16, #tpu.memory_space<vmem>>, %arg3: memref<32x1xf32, #tpu.memory_space<vmem>>, %arg4: memref<32x128xbf16, #tpu.memory_space<vmem>>) attributes {dimension_semantics = [#tpu.dimension_semantics<parallel>], iteration_bounds = array<i64: 1>, scalar_prefetch = 0 : i64, scratch_operands = 0 : i64, tpu.core_type = #tpu.core_type<tc>, window_params = [{pipeline_mode = #tpu.pipeline_mode<synchronous>, transform_indices = @transform_0, window_bounds = array<i64: 32, 400>}, {transform_indices = @transform_1, window_bounds = array<i64: 400, 128>}, {pipeline_mode = #tpu.pipeline_mode<synchronous>, transform_indices = @transform_2, window_bounds = array<i64: 32, 1>}, {transform_indices = @transform_3, window_bounds = array<i64: 32, 128>}]} {
    %c0 = arith.constant 0 : index
    %c0_0 = arith.constant 0 : index
    %0 = vector.load %arg1[%c0, %c0_0] : memref<32x400xbf16, #tpu.memory_space<vmem>>, vector<32x400xbf16>
    %c0_1 = arith.constant 0 : index
    %c0_2 = arith.constant 0 : index
    %1 = vector.load %arg2[%c0_1, %c0_2] : memref<400x128xbf16, #tpu.memory_space<vmem>>, vector<400x128xbf16>
    %cst = arith.constant dense<0.000000e+00> : vector<32x128xf32>
    %2 = tpu.matmul %0, %1, %cst {dimension_numbers = #tpu.dot_dimension_numbers<[1], [0], [0], [1], [0, 0, 1, 1], [], []>} : vector<32x400xbf16>, vector<400x128xbf16>, vector<32x128xf32> -> vector<32x128xf32>
    %c0_3 = arith.constant 0 : index
    %c0_4 = arith.constant 0 : index
    %3 = vector.load %arg3[%c0_3, %c0_4] : memref<32x1xf32, #tpu.memory_space<vmem>>, vector<32x1xf32>
    %4 = vector.broadcast %3 : vector<32x1xf32> to vector<32x128xf32>
    %5 = arith.addf %2, %4 : vector<32x128xf32>
    %cst_5 = arith.constant 0.000000e+00 : f32
    %6 = vector.broadcast %cst_5 : f32 to vector<32x128xf32>
    %7 = arith.cmpf oge, %5, %6 : vector<32x128xf32>
    %cst_6 = arith.constant 2.000000e-01 : f32
    %8 = vector.broadcast %cst_6 : f32 to vector<32x128xf32>
    %9 = arith.mulf %8, %5 : vector<32x128xf32>
    %10 = arith.select %7, %5, %9 : vector<32x128xi1>, vector<32x128xf32>
    %11 = arith.truncf %10 : vector<32x128xf32> to vector<32x128xbf16>
    %c0_7 = arith.constant 0 : index
    %c0_8 = arith.constant 0 : index
    %12 = vector.load %arg4[%c0_7, %c0_8] : memref<32x128xbf16, #tpu.memory_space<vmem>>, vector<32x128xbf16>
    tpu.vector_store %arg4[%c0_7, %c0_8], %11 {strides = array<i32>} : memref<32x128xbf16, #tpu.memory_space<vmem>>, vector<32x128xbf16>,
    return
  }
  func.func @transform_0(%arg0: i32) -> (i32, i32) {
    %c0_i32 = arith.constant 0 : i32
    %c0_i32_0 = arith.constant 0 : i32
    %c0_i32_1 = arith.constant 0 : i32
    return %c0_i32, %c0_i32_0 : i32, i32
  }
  func.func @transform_1(%arg0: i32) -> (i32, i32) {
    %c0_i32 = arith.constant 0 : i32
    %c0_i32_0 = arith.constant 0 : i32
    return %c0_i32, %arg0 : i32, i32
  }
  func.func @transform_2(%arg0: i32) -> (i32, i32) {
    %c0_i32 = arith.constant 0 : i32
    %c0_i32_0 = arith.constant 0 : i32
    %c0_i32_1 = arith.constant 0 : i32
    return %c0_i32, %c0_i32_0 : i32, i32
  }
  func.func @transform_3(%arg0: i32) -> (i32, i32) {
    %c0_i32 = arith.constant 0 : i32
    %c0_i32_0 = arith.constant 0 : i32
    return %c0_i32, %arg0 : i32, i32
  }
}

module attributes {stable_mosaic.version = 11 : i64} {
  func.func @_conv3_linear_fused_kernel(%arg0: i32, %arg1: memref<64x800xbf16, #tpu.memory_space<vmem>>, %arg2: memref<800x128xbf16, #tpu.memory_space<vmem>>, %arg3: memref<64x1xf32, #tpu.memory_space<vmem>>, %arg4: memref<64x128xf32, #tpu.memory_space<vmem>>, %arg5: memref<1x128xf32, #tpu.memory_space<vmem>>) attributes {dimension_semantics = [#tpu.dimension_semantics<parallel>], iteration_bounds = array<i64: 1>, scalar_prefetch = 0 : i64, scratch_operands = 0 : i64, tpu.core_type = #tpu.core_type<tc>, window_params = [{pipeline_mode = #tpu.pipeline_mode<synchronous>, transform_indices = @transform_0, window_bounds = array<i64: 64, 800>}, {transform_indices = @transform_1, window_bounds = array<i64: 800, 128>}, {pipeline_mode = #tpu.pipeline_mode<synchronous>, transform_indices = @transform_2, window_bounds = array<i64: 64, 1>}, {pipeline_mode = #tpu.pipeline_mode<synchronous>, transform_indices = @transform_3, window_bounds = array<i64: 64, 128>}, {transform_indices = @transform_4, window_bounds = array<i64: 1, 128>}]} {
    %c0 = arith.constant 0 : index
    %c0_0 = arith.constant 0 : index
    %0 = vector.load %arg1[%c0, %c0_0] : memref<64x800xbf16, #tpu.memory_space<vmem>>, vector<64x800xbf16>
    %c0_1 = arith.constant 0 : index
    %c0_2 = arith.constant 0 : index
    %1 = vector.load %arg2[%c0_1, %c0_2] : memref<800x128xbf16, #tpu.memory_space<vmem>>, vector<800x128xbf16>
    %cst = arith.constant dense<0.000000e+00> : vector<64x128xf32>
    %2 = tpu.matmul %0, %1, %cst {dimension_numbers = #tpu.dot_dimension_numbers<[1], [0], [0], [1], [0, 0, 1, 1], [], []>} : vector<64x800xbf16>, vector<800x128xbf16>, vector<64x128xf32> -> vector<64x128xf32>
    %c0_3 = arith.constant 0 : index
    %c0_4 = arith.constant 0 : index
    %3 = vector.load %arg3[%c0_3, %c0_4] : memref<64x1xf32, #tpu.memory_space<vmem>>, vector<64x1xf32>
    %4 = vector.broadcast %3 : vector<64x1xf32> to vector<64x128xf32>
    %5 = arith.addf %2, %4 : vector<64x128xf32>
    %cst_5 = arith.constant 0.000000e+00 : f32
    %6 = vector.broadcast %cst_5 : f32 to vector<64x128xf32>
    %7 = arith.cmpf oge, %5, %6 : vector<64x128xf32>
    %cst_6 = arith.constant 2.000000e-01 : f32
    %8 = vector.broadcast %cst_6 : f32 to vector<64x128xf32>
    %9 = arith.mulf %8, %5 : vector<64x128xf32>
    %10 = arith.select %7, %5, %9 : vector<64x128xi1>, vector<64x128xf32>
    %c0_7 = arith.constant 0 : index
    %c0_8 = arith.constant 0 : index
    %11 = vector.load %arg4[%c0_7, %c0_8] : memref<64x128xf32, #tpu.memory_space<vmem>>, vector<64x128xf32>
    %12 = arith.mulf %10, %11 : vector<64x128xf32>
    %cst_9 = arith.constant dense<0.000000e+00> : vector<128xf32>
    %13 = vector.multi_reduction <add>, %12, %cst_9 [0] : vector<64x128xf32> to vector<128xf32>
    %14 = vector.shape_cast %13 : vector<128xf32> to vector<1x128xf32>
    %c0_10 = arith.constant 0 : index
    %c0_11 = arith.constant 0 : index
    %15 = vector.load %arg5[%c0_10, %c0_11] : memref<1x128xf32, #tpu.memory_space<vmem>>, vector<1x128xf32>
    tpu.vector_store %arg5[%c0_10, %c0_11], %14 {strides = array<i32>} : memref<1x128xf32, #tpu.memory_space<vmem>>, vector<1x128xf32>,
    return
  }
  func.func @transform_0(%arg0: i32) -> (i32, i32) {
    %c0_i32 = arith.constant 0 : i32
    %c0_i32_0 = arith.constant 0 : i32
    %c0_i32_1 = arith.constant 0 : i32
    return %c0_i32, %c0_i32_0 : i32, i32
  }
  func.func @transform_1(%arg0: i32) -> (i32, i32) {
    %c0_i32 = arith.constant 0 : i32
    %c0_i32_0 = arith.constant 0 : i32
    return %c0_i32, %arg0 : i32, i32
  }
  func.func @transform_2(%arg0: i32) -> (i32, i32) {
    %c0_i32 = arith.constant 0 : i32
    %c0_i32_0 = arith.constant 0 : i32
    %c0_i32_1 = arith.constant 0 : i32
    return %c0_i32, %c0_i32_0 : i32, i32
  }
  func.func @transform_3(%arg0: i32) -> (i32, i32) {
    %c0_i32 = arith.constant 0 : i32
    %c0_i32_0 = arith.constant 0 : i32
    %c0_i32_1 = arith.constant 0 : i32
    return %c0_i32, %c0_i32_0 : i32, i32
  }
  func.func @transform_4(%arg0: i32) -> (i32, i32) {
    %c0_i32 = arith.constant 0 : i32
    %c0_i32_0 = arith.constant 0 : i32
    return %c0_i32, %arg0 : i32, i32
  }
}

</mosaic_0001>

<bundles_post_ra>
// kernel: discriminator_forward.3
= control target key start
LH: loop header
LB: loop body
LE: loop exit
PB: predicated region body
PF: predicated region fallthrough
CT: control target
= control target key end

     0   :  { %vm82_vm0 = vcmask 1043456   ;;  %vm83_vm1 = vcmask 1044480   ;;  %v275_v1 = vmov 0   ;;  %v276_v2 = vmov 65535   ;;  %s342_s1 = inlined_call_operand.vmem [shape: bf16[25,512], index: 1, kind: input, shape index: {}]   ;;  %s343_s2 = inlined_call_operand.vmem [shape: f32[16,1], index: 2, kind: input, shape index: {}]   ;;  %s344_s0 = inlined_call_operand.vmem [shape: bf16[16,25], index: 0, kind: input, shape index: {}]   ;;  %s345_s3 = inlined_call_operand.vmem [shape: bf16[16,512], index: 3, kind: output, shape index: {}]  }
   0x1   :  { %v262_v0 = vld [vmem:[%s342_s1 + $0x24] ss:$16 sps:$4 sm:$0x1f]   ;;  %130 = vmatprep.mubr.bf16.mxu0 %v275_v1  ;;  %173 = vmatprep.mubr.bf16.mxu1 %v275_v1  ;;  %v84_v3 = vsel %vm82_vm0, 4294967295, %v276_v2  ;;  %v270_v11 = vld [vmem:[%s342_s1 + $0xc] ss:$16 sps:$4 sm:$0xff]  }
   0x2   :  { %261 = vset.pattern.permute.xlu0 %v275_v1  ;;  %v85_v4 = vsel %vm83_vm1, %v84_v3, 0  ;;  %v264_v5 = vld [vmem:[%s342_s1 + $0x2c] ss:$16 sps:$4 sm:$0x1f]   ;;  %v268_v10 = vld [vmem:[%s342_s1 + $0x4] ss:$16 sps:$4 sm:$0xff]  }
   0x3   :  { %v90_v6 = vand.u32 %v262_v0, %v85_v4  ;;  %v266_v7 = vld [vmem:[%s342_s1 + $0x20] ss:$16 sps:$4 sm:$0x1f]   ;;  %v267_v8 = vld [vmem:[%s342_s1 + $0x28] ss:$16 sps:$4 sm:$0x1f]   ;;  %v96_v9 = vand.u32 %v264_v5, %v85_v4 }
   0x4   :  { %v87_v12 = vand.u32 %v266_v7, %v85_v4  ;;  %v93_v13 = vand.u32 %v267_v8, %v85_v4  ;;  %v25_v14 = vld [vmem:[%s343_s2] sm:$0xff]  ;;  %v273_v16 = vld [vmem:[%s342_s1 + $0x8] ss:$16 sps:$4 sm:$0xff]   ;;  %vm78_vm2 = vcmask 203776  }
   0x5   :  { %110 = vmatprep.subr.bf16.mxu0 %v90_v6  ;;  %153 = vmatprep.subr.bf16.mxu1 %v96_v9  ;;  %v272_v15 = vld [vmem:[%s342_s1] ss:$16 sps:$4 sm:$0xff]   ;;  %v26_v18 = vld [vmem:[%s343_s2 + $0x8] sm:$0xff] }
   0x6   :  { %111 = vmatpush1.bf16.msra.mxu0 %v87_v12  ;;  %154 = vmatpush1.bf16.msra.mxu1 %v93_v13  ;;  %v274_v17 = vld [vmem:[%s344_s0] sm:$0xff]  }
   0x7   :  { %112 = vmatprep.subr.bf16.mxu0 %v268_v10  ;;  %155 = vmatprep.subr.bf16.mxu1 %v270_v11 }
   0x8   :  { %29 = vperm.xlu0 %261, %v25_v14  }
   0xa   :  { %113 = vmatpush1.bf16.msra.mxu0 %v272_v15  ;;  %156 = vmatpush1.bf16.msra.mxu1 %v273_v16 }
   0xc   :  { %34 = vperm.xlu0 %261, %v26_v18  }
   0xd   :  { %249 = vmatmul.mubr.msk.bf16.vlgmr.msra.gmra.mxu0 %vm78_vm2, %v274_v17  ;;  %250 = vmatmul.mubr.msk.bf16.vlgmr.msra.gmra.mxu1 %vm78_vm2, %v274_v17 }
  0x83   :  { %v30_v19 = vpop.permute.xlu0 %29 }
  0x87   :  { %v35_v28 = vpop.permute.xlu0 %34 }
  0xcd   :  { %v132_v20 = vpop.f32.mrf.mxu0  ;;  %v175_v21 = vpop.f32.mrf.mxu1 }
  0xce   :  { %v133_v22 = vadd.f32 %v132_v20, %v30_v19  ;;  %v176_v23 = vadd.f32 %v175_v21, %v30_v19 }
  0xcf   :  { %v134_v24 = vpop.f32.mrf.mxu0  ;;  %v177_v25 = vpop.f32.mrf.mxu1 }
  0xd0   :  { %v192_v26 = vmul.f32 0.2, %v133_v22  ;;  %v194_v27 = vmul.f32 0.2, %v176_v23  ;;  %vm184_vm3 = vcmp.ge.f32.partialorder %v133_v22, 0.0  ;;  %vm186_vm4 = vcmp.ge.f32.partialorder %v176_v23, 0.0 }
  0xd1   :  { %v135_v29 = vadd.f32 %v134_v24, %v30_v19  ;;  %v178_v30 = vadd.f32 %v177_v25, %v30_v19  ;;  %v136_v31 = vpop.f32.mrf.mxu0  ;;  %v179_v32 = vpop.f32.mrf.mxu1 }
  0xd2   :  { %v137_v33 = vadd.f32 %v136_v31, %v35_v28  ;;  %v180_v34 = vadd.f32 %v179_v32, %v35_v28  ;;  %v200_v39 = vsel %vm184_vm3, %v133_v22, %v192_v26  ;;  %v202_v40 = vsel %vm186_vm4, %v176_v23, %v194_v27 }
  0xd3   :  { %vm185_vm5 = vcmp.ge.f32.partialorder %v135_v29, 0.0  ;;  %v193_v35 = vmul.f32 0.2, %v135_v29  ;;  %vm187_vm6 = vcmp.ge.f32.partialorder %v178_v30, 0.0  ;;  %v195_v36 = vmul.f32 0.2, %v178_v30  ;;  %v138_v37 = vpop.f32.mrf.mxu0  ;;  %v181_v38 = vpop.f32.mrf.mxu1 }
  0xd4   :  { %v196_v41 = vmul.f32 0.2, %v137_v33  ;;  %v198_v42 = vmul.f32 0.2, %v180_v34  ;;  %v139_v45 = vadd.f32 %v138_v37, %v35_v28  ;;  %v182_v46 = vadd.f32 %v181_v38, %v35_v28 }
  0xd5   :  { %v201_v43 = vsel %vm185_vm5, %v135_v29, %v193_v35  ;;  %v203_v44 = vsel %vm187_vm6, %v178_v30, %v195_v36  ;;  %vm188_vm7 = vcmp.ge.f32.partialorder %v137_v33, 0.0  ;;  %vm190_vm8 = vcmp.ge.f32.partialorder %v180_v34, 0.0 }
  0xd6   :  { %v255_v47 = vpack.c.bf16 %v201_v43, %v200_v39  ;;  %v256_v48 = vpack.c.bf16 %v203_v44, %v202_v40  ;;  %vm189_vm9 = vcmp.ge.f32.partialorder %v139_v45, 0.0  ;;  %v197_v49 = vmul.f32 0.2, %v139_v45 }
  0xd7   :  { %vm191_vm10 = vcmp.ge.f32.partialorder %v182_v46, 0.0  ;;  %v199_v50 = vmul.f32 0.2, %v182_v46  ;;  %v204_v51 = vsel %vm188_vm7, %v137_v33, %v196_v41  ;;  %v206_v52 = vsel %vm190_vm8, %v180_v34, %v198_v42 }
  0xd8   :  { %232 = vst [vmem:[%s345_s3] sm:$0xff] %v255_v47  ;;  %233 = vst [vmem:[%s345_s3 + $0x8] sm:$0xff] %v256_v48  ;;  %v205_v53 = vsel %vm189_vm9, %v139_v45, %v197_v49 }
  0xd9   :  { %v207_v54 = vsel %vm191_vm10, %v182_v46, %v199_v50  ;;  %v257_v55 = vpack.c.bf16 %v205_v53, %v204_v51 }
  0xda   :  { %v258_v56 = vpack.c.bf16 %v207_v54, %v206_v52 }
  0xdb   :  { %234 = vst [vmem:[%s345_s3 + $0x10] sm:$0xff] %v257_v55 }
  0xdc   :  { %235 = vst [vmem:[%s345_s3 + $0x18] sm:$0xff] %v258_v56 }

// kernel: discriminator_forward.4
= control target key start
LH: loop header
LB: loop body
LE: loop exit
PB: predicated region body
PF: predicated region fallthrough
CT: control target
= control target key end

     0   :  { %v548_v0 = vmov 0   ;;  %vm285_vm0 = vcmask 130048   ;;  %s699_s1 = inlined_call_operand.vmem [shape: bf16[400,128], index: 1, kind: input, shape index: {}]   ;;  %s700_s0 = inlined_call_operand.vmem [shape: bf16[32,400], index: 0, kind: input, shape index: {}]   ;;  %s701_s2 = inlined_call_operand.vmem [shape: f32[32,1], index: 2, kind: input, shape index: {}]   ;;  %s702_s3 = inlined_call_operand.vmem [shape: bf16[32,128], index: 3, kind: output, shape index: {}]  }
   0x1   :  { %341 = vmatprep.subr.bf16.mxu1 %v548_v0  ;;  %v511_v1 = vld [vmem:[%s699_s1 + $0x78] sm:$0xff]   ;;  %509 = vset.pattern.permute.xlu0 %v548_v0  ;;  %v514_v4 = vld [vmem:[%s699_s1 + $0x70] sm:$0xff]   ;;  %v517_v7 = vld [vmem:[%s699_s1 + $0x68] sm:$0xff]  }
   0x2   :  { %v512_v2 = vld [vmem:[%s699_s1 + $0xb8] sm:$0xff]   ;;  %510 = vset.pattern.permute.xlu1 %v548_v0  ;;  %480 = vmatprep.subr.bf16.mxu0 %v511_v1  ;;  %v515_v5 = vld [vmem:[%s699_s1 + $0xb0] sm:$0xff]   ;;  %v518_v8 = vld [vmem:[%s699_s1 + $0xa8] sm:$0xff]  }
   0x3   :  { %v513_v3 = vld [vmem:[%s699_s1 + $0x38] sm:$0xff]   ;;  %342 = vmatpush1.bf16.msra.mxu1 %v512_v2  ;;  %v516_v6 = vld [vmem:[%s699_s1 + $0x30] sm:$0xff]   ;;  %v519_v9 = vld [vmem:[%s699_s1 + $0x28] sm:$0xff]  }
   0x4   :  { %481 = vmatpush3.bf16.msra.mxu0 %v513_v3  ;;  %343 = vmatprep.subr.bf16.mxu1 %v548_v0  ;;  %v520_v10 = vld [vmem:[%s699_s1 + $0x60] sm:$0xff]   ;;  %v523_v13 = vld [vmem:[%s699_s1 + $0x58] sm:$0xff]   ;;  %v526_v16 = vld [vmem:[%s699_s1 + $0x50] sm:$0xff]  }
   0x5   :  { %482 = vmatprep.subr.bf16.mxu0 %v514_v4  ;;  %v521_v11 = vld [vmem:[%s699_s1 + $0xa0] sm:$0xff]   ;;  %v524_v14 = vld [vmem:[%s699_s1 + $0x98] sm:$0xff]   ;;  %v527_v17 = vld [vmem:[%s699_s1 + $0x90] sm:$0xff]  }
   0x6   :  { %v522_v12 = vld [vmem:[%s699_s1 + $0x20] sm:$0xff]   ;;  %v525_v15 = vld [vmem:[%s699_s1 + $0x18] sm:$0xff]   ;;  %v528_v18 = vld [vmem:[%s699_s1 + $0x10] sm:$0xff]  }
   0x7   :  { %344 = vmatpush1.bf16.msra.mxu1 %v515_v5  ;;  %v529_v19 = vld [vmem:[%s699_s1 + $0x48] sm:$0xff]   ;;  %v532_v22 = vld [vmem:[%s699_s1 + $0x40] sm:$0xff]   ;;  %v75_v28 = vld [vmem:[%s701_s2 + $0x10] sm:$0xff] }
   0x8   :  { %483 = vmatpush3.bf16.msra.mxu0 %v516_v6  ;;  %345 = vmatprep.subr.bf16.mxu1 %v548_v0  ;;  %v530_v20 = vld [vmem:[%s699_s1 + $0x88] sm:$0xff]   ;;  %v537_v23 = vld [vmem:[%s700_s0 + $0x4] ss:$16 sps:$4 sm:$0xff]   ;;  %v535_v29 = vld [vmem:[%s700_s0] ss:$16 sps:$4 sm:$0xff]  }
   0x9   :  { %484 = vmatprep.subr.bf16.mxu0 %v517_v7  ;;  %v531_v21 = vld [vmem:[%s699_s1 + $0x8] sm:$0xff]   ;;  %v533_v24 = vld [vmem:[%s699_s1 + $0x80] sm:$0xff]   ;;  %324 = vmatprep.mubr.bf16.mxu0 %v537_v23  ;;  %v76_v34 = vld [vmem:[%s701_s2 + $0x18] sm:$0xff] }
   0xa   :  { %v541_v25 = vld [vmem:[%s700_s0 + $0xc] ss:$16 sps:$4 sm:$0xff]   ;;  %v534_v26 = vld [vmem:[%s699_s1] sm:$0xff]   ;;  %89 = vperm.xlu1 %510, %v75_v28   ;;  %v539_v33 = vld [vmem:[%s700_s0 + $0x8] ss:$16 sps:$4 sm:$0xff]  }
   0xb   :  { %346 = vmatpush1.bf16.msra.mxu1 %v518_v8  ;;  %459 = vmatprep.mubr.msk.bf16.mxu1 %vm285_vm0, %v541_v25  ;;  %v73_v27 = vld [vmem:[%s701_s2] sm:$0xff]  ;;  %v74_v32 = vld [vmem:[%s701_s2 + $0x8] sm:$0xff] }
   0xc   :  { %485 = vmatpush3.bf16.msra.mxu0 %v519_v9  ;;  %347 = vmatprep.subr.bf16.mxu1 %v548_v0  ;;  %v538_v30 = vld [vmem:[%s699_s1 + $0xc0] sm:$0xff]   ;;  %v545_v35 = vld [vmem:[%s700_s0 + $0x2c] ss:$16 sps:$4 sm:$0xff]   ;;  %v547_v37 = vld [vmem:[%s700_s0 + $0x28] ss:$16 sps:$4 sm:$0xff]  }
   0xd   :  { %486 = vmatprep.subr.bf16.mxu0 %v520_v10  ;;  %79 = vperm.xlu0 %509, %v73_v27   ;;  %v542_v31 = vld [vmem:[%s700_s0 + $0x24] ss:$16 sps:$4 sm:$0xff]   ;;  %v544_v36 = vld [vmem:[%s700_s0 + $0x20] ss:$16 sps:$4 sm:$0xff]  }
   0xe   :  { %94 = vperm.xlu1 %510, %v76_v34  }
   0xf   :  { %348 = vmatpush1.bf16.msra.mxu1 %v521_v11 }
  0x10   :  { %487 = vmatpush3.bf16.msra.mxu0 %v522_v12  ;;  %349 = vmatprep.subr.bf16.mxu1 %v548_v0 }
  0x11   :  { %488 = vmatprep.subr.bf16.mxu0 %v523_v13  ;;  %84 = vperm.xlu0 %509, %v74_v32  }
  0x13   :  { %350 = vmatpush1.bf16.msra.mxu1 %v524_v14 }
  0x14   :  { %489 = vmatpush3.bf16.msra.mxu0 %v525_v15  ;;  %351 = vmatprep.subr.bf16.mxu1 %v548_v0 }
  0x15   :  { %490 = vmatprep.subr.bf16.mxu0 %v526_v16 }
  0x17   :  { %352 = vmatpush1.bf16.msra.mxu1 %v527_v17 }
  0x18   :  { %491 = vmatpush3.bf16.msra.mxu0 %v528_v18  ;;  %353 = vmatprep.subr.bf16.mxu1 %v548_v0 }
  0x19   :  { %492 = vmatprep.subr.bf16.mxu0 %v529_v19 }
  0x1b   :  { %354 = vmatpush1.bf16.msra.mxu1 %v530_v20 }
  0x1c   :  { %493 = vmatpush3.bf16.msra.mxu0 %v531_v21  ;;  %355 = vmatprep.subr.bf16.mxu1 %v548_v0 }
  0x1d   :  { %494 = vmatprep.subr.bf16.mxu0 %v532_v22 }
  0x1f   :  { %356 = vmatpush1.bf16.msra.mxu1 %v533_v24 }
  0x20   :  { %495 = vmatpush3.bf16.msra.mxu0 %v534_v26  ;;  %371 = vmatprep.subr.bf16.mxu1 %v548_v0 }
  0x23   :  { %325 = vmatmul.mubr.bf16.vlgmr.msra.gmra.mxu0 %v535_v29  ;;  %372 = vmatpush2.bf16.msra.mxu1 %v538_v30 }
  0x24   :  { %332 = vmatprep.mubr.bf16.mxu0 %v542_v31 }
  0x26   :  { %374 = vmatmul.mubr.bf16.vlgmr.msra.gmra.mxu1 %v539_v33 }
  0x27   :  { %460 = vmatprep.mubr.msk.bf16.mxu1 %vm285_vm0, %v545_v35 }
  0x2b   :  { %333 = vmatmul.mubr.bf16.gmra.mxu0 %v544_v36 }
  0x2e   :  { %382 = vmatmul.mubr.bf16.gmra.mxu1 %v547_v37 }
  0x85   :  { %v90_v54 = vpop.permute.xlu1 %89 }
  0x88   :  { %v80_v39 = vpop.permute.xlu0 %79 }
  0x89   :  { %v95_v7 = vpop.permute.xlu1 %94 }
  0x8c   :  { %v85_v47 = vpop.permute.xlu0 %84 }
  0xe3   :  { %v496_v38 = vpop.f32.mrf.mxu0 }
  0xe5   :  { %v497_v40 = vpop.f32.mrf.mxu0 }
  0xe6   :  { %v498_v41 = vadd.f32 %v497_v40, %v496_v38  ;;  %v375_v42 = vpop.f32.mrf.mxu1 }
  0xe7   :  { %v499_v43 = vpop.f32.mrf.mxu0 }
  0xe8   :  { %v327_v44 = vadd.f32 %v498_v41, %v80_v39  ;;  %v377_v45 = vpop.f32.mrf.mxu1 }
  0xe9   :  { %v500_v46 = vpop.f32.mrf.mxu0 }
  0xea   :  { %v376_v48 = vadd.f32 %v375_v42, %v327_v44  ;;  %v501_v49 = vadd.f32 %v500_v46, %v499_v43  ;;  %v378_v50 = vpop.f32.mrf.mxu1 }
  0xeb   :  { %v502_v51 = vpop.f32.mrf.mxu0 }
  0xec   :  { %v330_v52 = vadd.f32 %v501_v49, %v85_v47  ;;  %v380_v53 = vpop.f32.mrf.mxu1  ;;  %v394_v56 = vmul.f32 0.2, %v376_v48  ;;  %vm390_vm1 = vcmp.ge.f32.partialorder %v376_v48, 0.0 }
  0xed   :  { %v503_v55 = vpop.f32.mrf.mxu0 }
  0xee   :  { %v379_v57 = vadd.f32 %v378_v50, %v330_v52  ;;  %v504_v58 = vadd.f32 %v503_v55, %v502_v51  ;;  %v383_v59 = vpop.f32.mrf.mxu1  ;;  %v398_v1 = vsel %vm390_vm1, %v376_v48, %v394_v56 }
  0xef   :  { %v505_v60 = vpop.f32.mrf.mxu0 }
  0xf0   :  { %vm391_vm2 = vcmp.ge.f32.partialorder %v379_v57, 0.0  ;;  %v395_v61 = vmul.f32 0.2, %v379_v57  ;;  %v335_v62 = vadd.f32 %v504_v58, %v90_v54  ;;  %v385_v63 = vpop.f32.mrf.mxu1 }
  0xf1   :  { %v506_v0 = vpop.f32.mrf.mxu0 }
  0xf2   :  { %v399_v2 = vsel %vm391_vm2, %v379_v57, %v395_v61  ;;  %v384_v3 = vadd.f32 %v383_v59, %v335_v62  ;;  %v507_v4 = vadd.f32 %v506_v0, %v505_v60  ;;  %v386_v5 = vpop.f32.mrf.mxu1 }
  0xf3   :  { %v472_v6 = vpack.c.bf16 %v399_v2, %v398_v1 }
  0xf4   :  { %v338_v8 = vadd.f32 %v507_v4, %v95_v7  ;;  %v388_v9 = vpop.f32.mrf.mxu1  ;;  %v396_v10 = vmul.f32 0.2, %v384_v3  ;;  %vm392_vm3 = vcmp.ge.f32.partialorder %v384_v3, 0.0 }
  0xf5   :  { %473 = vst [vmem:[%s702_s3] sm:$0xff] %v472_v6  }
  0xf6   :  { %v387_v11 = vadd.f32 %v386_v5, %v338_v8  ;;  %v400_v13 = vsel %vm392_vm3, %v384_v3, %v396_v10 }
  0xf8   :  { %vm393_vm4 = vcmp.ge.f32.partialorder %v387_v11, 0.0  ;;  %v397_v12 = vmul.f32 0.2, %v387_v11 }
  0xfa   :  { %v401_v14 = vsel %vm393_vm4, %v387_v11, %v397_v12 }
  0xfb   :  { %v477_v15 = vpack.c.bf16 %v401_v14, %v400_v13 }
  0xfd   :  { %479 = vst [vmem:[%s702_s3 + $0x8] sm:$0xff] %v477_v15  }

// kernel: squeeze.1
= control target key start
LH: loop header
LB: loop body
LE: loop exit
PB: predicated region body
PF: predicated region fallthrough
CT: control target
= control target key end

     0   :  { %vm8_vm0 = vcmask 130048   ;;  %s42_s0 = inlined_call_operand.vmem [shape: f32[32], index: 0, kind: input, shape index: {}]   ;;  %s43_s1 = inlined_call_operand.vmem [shape: f32[2,16], index: 1, kind: output, shape index: {}]  }
   0x1   :  { %v5_v0 = vld [vmem:[%s42_s0] sm:$0x1]  ;;  %s25_s0 = smov 112  }
   0x2   :  { %6 = vst [vmem:[#allocation1] sm:$0x1] %v5_v0 }
   0x9   :  { %v10_v1 = vld [vmem:[#allocation1] sm:$0x1]  }
   0xa   :  { %v7_v2 = vld [vmem:[#allocation1] sm:$0x1]   ;;  %11 = vrot.lane.b32.xlu0 %v10_v1, %s25_s0 }
   0xb   :  { %9 = vst.msk [vmem:[#allocation0] sm:$0x1] %vm8_vm0, %v7_v2  }
  0x7c   :  { %v12_v3 = vpop.permute.xlu0 %11  }
  0x7d   :  { %15 = vst.msk [vmem:[#allocation0 + $0x1] sm:$0x1] %vm8_vm0, %v12_v3  }
  0x84   :  { %v20_v4 = vld [vmem:[#allocation0] sm:$0x3] }
  0x85   :  { %23 = vst [vmem:[%s43_s1] sm:$0x3] %v20_v4 }

// kernel: discriminator_forward.5
= control target key start
LH: loop header
LB: loop body
LE: loop exit
PB: predicated region body
PF: predicated region fallthrough
CT: control target
= control target key end

     0   :  { %v1298_v1 = vmov 0   ;;  %vm638_vm0 = vcmask 261120   ;;  %s1631_s1 = inlined_call_operand.vmem [shape: bf16[800,128], index: 1, kind: input, shape index: {}]   ;;  %s1632_s0 = inlined_call_operand.vmem [shape: bf16[64,800], index: 0, kind: input, shape index: {}]   ;;  %s1633_s2 = inlined_call_operand.vmem [shape: f32[64,1], index: 2, kind: input, shape index: {}]   ;;  %s1634_s3 = inlined_call_operand.vmem [shape: f32[64,128], index: 3, kind: input, shape index: {}]   ;;  %s1635_s4 = inlined_call_operand.vmem [shape: f32[1,128], index: 4, kind: output, shape index: {}]  }
   0x1   :  { %v1208_v0 = vld [vmem:[%s1631_s1 + $0x78] sm:$0xff]   ;;  %1206 = vset.pattern.permute.xlu0 %v1298_v1  ;;  %1207 = vset.pattern.permute.xlu1 %v1298_v1  ;;  %v1212_v5 = vld [vmem:[%s1631_s1 + $0x70] sm:$0xff]   ;;  %v1216_v9 = vld [vmem:[%s1631_s1 + $0x68] sm:$0xff]  }
   0x2   :  { %v1209_v2 = vld [vmem:[%s1631_s1 + $0xf8] sm:$0xff]   ;;  %1051 = vmatprep.subr.bf16.mxu0 %v1208_v0  ;;  %v1213_v6 = vld [vmem:[%s1631_s1 + $0xf0] sm:$0xff]   ;;  %v1217_v10 = vld [vmem:[%s1631_s1 + $0xe8] sm:$0xff]  }
   0x3   :  { %v1210_v3 = vld [vmem:[%s1631_s1 + $0x38] sm:$0xff]   ;;  %1091 = vmatprep.subr.bf16.mxu1 %v1209_v2  ;;  %v1214_v7 = vld [vmem:[%s1631_s1 + $0x30] sm:$0xff]   ;;  %v1218_v11 = vld [vmem:[%s1631_s1 + $0x28] sm:$0xff]  }
   0x4   :  { %v1211_v4 = vld [vmem:[%s1631_s1 + $0xb8] sm:$0xff]   ;;  %1052 = vmatpush3.bf16.msra.mxu0 %v1210_v3  ;;  %v1215_v8 = vld [vmem:[%s1631_s1 + $0xb0] sm:$0xff]   ;;  %v1219_v12 = vld [vmem:[%s1631_s1 + $0xa8] sm:$0xff]  }
   0x5   :  { %1092 = vmatpush3.bf16.msra.mxu1 %v1211_v4  ;;  %1053 = vmatprep.subr.bf16.mxu0 %v1212_v5  ;;  %v1220_v13 = vld [vmem:[%s1631_s1 + $0x60] sm:$0xff]   ;;  %v1224_v17 = vld [vmem:[%s1631_s1 + $0x58] sm:$0xff]   ;;  %v1228_v21 = vld [vmem:[%s1631_s1 + $0x50] sm:$0xff]  }
   0x6   :  { %1093 = vmatprep.subr.bf16.mxu1 %v1213_v6  ;;  %v1221_v14 = vld [vmem:[%s1631_s1 + $0xe0] sm:$0xff]   ;;  %v1225_v18 = vld [vmem:[%s1631_s1 + $0xd8] sm:$0xff]   ;;  %v1229_v22 = vld [vmem:[%s1631_s1 + $0xd0] sm:$0xff]  }
   0x7   :  { %v1222_v15 = vld [vmem:[%s1631_s1 + $0x20] sm:$0xff]   ;;  %v1226_v19 = vld [vmem:[%s1631_s1 + $0x18] sm:$0xff]   ;;  %v1230_v23 = vld [vmem:[%s1631_s1 + $0x10] sm:$0xff]  }
   0x8   :  { %1054 = vmatpush3.bf16.msra.mxu0 %v1214_v7  ;;  %v1223_v16 = vld [vmem:[%s1631_s1 + $0xa0] sm:$0xff]   ;;  %v1227_v20 = vld [vmem:[%s1631_s1 + $0x98] sm:$0xff]   ;;  %v1231_v24 = vld [vmem:[%s1631_s1 + $0x90] sm:$0xff]  }
   0x9   :  { %1094 = vmatpush3.bf16.msra.mxu1 %v1215_v8  ;;  %1055 = vmatprep.subr.bf16.mxu0 %v1216_v9  ;;  %v1232_v25 = vld [vmem:[%s1631_s1 + $0x48] sm:$0xff]   ;;  %v1236_v29 = vld [vmem:[%s1631_s1 + $0x40] sm:$0xff]   ;;  %v1246_v37 = vld [vmem:[%s1631_s1 + $0x178] sm:$0xff]  }
   0xa   :  { %1095 = vmatprep.subr.bf16.mxu1 %v1217_v10  ;;  %v1233_v26 = vld [vmem:[%s1631_s1 + $0xc8] sm:$0xff]   ;;  %v1237_v30 = vld [vmem:[%s1631_s1 + $0xc0] sm:$0xff]   ;;  %v1247_v38 = vld [vmem:[%s1631_s1 + $0x138] sm:$0xff]  }
   0xb   :  { %v1234_v27 = vld [vmem:[%s1631_s1 + $0x8] sm:$0xff]   ;;  %v1238_v31 = vld [vmem:[%s1631_s1] sm:$0xff]   ;;  %v1248_v39 = vld [vmem:[%s1631_s1 + $0x170] sm:$0xff]  }
   0xc   :  { %1056 = vmatpush3.bf16.msra.mxu0 %v1218_v11  ;;  %v1235_v28 = vld [vmem:[%s1631_s1 + $0x88] sm:$0xff]   ;;  %v1239_v32 = vld [vmem:[%s1631_s1 + $0x80] sm:$0xff]   ;;  %v1249_v40 = vld [vmem:[%s1631_s1 + $0x130] sm:$0xff]  }
   0xd   :  { %1096 = vmatpush3.bf16.msra.mxu1 %v1219_v12  ;;  %1057 = vmatprep.subr.bf16.mxu0 %v1220_v13  ;;  %v1240_v33 = vld [vmem:[%s1632_s0] ss:$28 sps:$4 sm:$0xff]   ;;  %v1243_v35 = vld [vmem:[%s1632_s0 + $0x8] ss:$28 sps:$4 sm:$0xff]   ;;  %v1254_v43 = vld [vmem:[%s1632_s0 + $0x38] ss:$28 sps:$4 sm:$0xff]  }
   0xe   :  { %1097 = vmatprep.subr.bf16.mxu1 %v1221_v14  ;;  %v1242_v34 = vld [vmem:[%s1632_s0 + $0x4] ss:$28 sps:$4 sm:$0xff]   ;;  %v1245_v36 = vld [vmem:[%s1632_s0 + $0xc] ss:$28 sps:$4 sm:$0xff]   ;;  %v1250_v41 = vld [vmem:[%s1632_s0 + $0x3c] ss:$28 sps:$4 sm:$0xff]  }
   0xf   :  { %683 = vmatprep.mubr.bf16.mxu0 %v1242_v34  ;;  %748 = vmatprep.mubr.bf16.mxu1 %v1245_v36  ;;  %v1252_v42 = vld [vmem:[%s1632_s0 + $0x44] ss:$28 sps:$4 sm:$0xff]   ;;  %v1256_v45 = vld [vmem:[%s1631_s1 + $0x168] sm:$0xff]   ;;  %v1260_v49 = vld [vmem:[%s1632_s0 + $0x74] ss:$28 sps:$4 sm:$0xff]  }
  0x10   :  { %1058 = vmatpush3.bf16.msra.mxu0 %v1222_v15  ;;  %v1255_v44 = vld [vmem:[%s1632_s0 + $0x40] ss:$28 sps:$4 sm:$0xff]   ;;  %v1257_v46 = vld [vmem:[%s1631_s1 + $0x128] sm:$0xff]   ;;  %v1265_v53 = vld [vmem:[%s1632_s0 + $0x78] ss:$28 sps:$4 sm:$0xff]  }
  0x11   :  { %1098 = vmatpush3.bf16.msra.mxu1 %v1223_v16  ;;  %1059 = vmatprep.subr.bf16.mxu0 %v1224_v17  ;;  %v1258_v47 = vld [vmem:[%s1631_s1 + $0x160] sm:$0xff]   ;;  %v1262_v50 = vld [vmem:[%s1632_s0 + $0x7c] ss:$28 sps:$4 sm:$0xff]   ;;  %v1264_v51 = vld [vmem:[%s1632_s0 + $0x70] ss:$28 sps:$4 sm:$0xff]  }
  0x12   :  { %1099 = vmatprep.subr.bf16.mxu1 %v1225_v18  ;;  %v1259_v48 = vld [vmem:[%s1631_s1 + $0x120] sm:$0xff]   ;;  %v1266_v52 = vld [vmem:[%s1631_s1 + $0x158] sm:$0xff]   ;;  %v1268_v55 = vld [vmem:[%s1631_s1 + $0x150] sm:$0xff]  }
  0x13   :  { %v1267_v54 = vld [vmem:[%s1631_s1 + $0x118] sm:$0xff]   ;;  %v1270_v56 = vld [vmem:[%s1632_s0 + $0xac] ss:$28 sps:$4 sm:$0xff]   ;;  %v1272_v57 = vld [vmem:[%s1632_s0 + $0xb4] ss:$28 sps:$4 sm:$0xff]  }
  0x14   :  { %1060 = vmatpush3.bf16.msra.mxu0 %v1226_v19  ;;  %v1269_v58 = vld [vmem:[%s1631_s1 + $0x110] sm:$0xff]   ;;  %v1276_v59 = vld [vmem:[%s1631_s1 + $0x148] sm:$0xff]   ;;  %v1278_v63 = vld [vmem:[%s1631_s1 + $0x140] sm:$0xff]  }
  0x15   :  { %1100 = vmatpush3.bf16.msra.mxu1 %v1227_v20  ;;  %1061 = vmatprep.subr.bf16.mxu0 %v1228_v21  ;;  %v1274_v60 = vld [vmem:[%s1632_s0 + $0xa8] ss:$28 sps:$4 sm:$0xff]   ;;  %v1275_v61 = vld [vmem:[%s1632_s0 + $0xb0] ss:$28 sps:$4 sm:$0xff]   ;;  %v1285_v1 = vld [vmem:[%s1632_s0 + $0xbc] ss:$28 sps:$4 sm:$0xff]  }
  0x16   :  { %1101 = vmatprep.subr.bf16.mxu1 %v1229_v22  ;;  %v1277_v62 = vld [vmem:[%s1631_s1 + $0x108] sm:$0xff]   ;;  %v1282_v0 = vld [vmem:[%s1632_s0 + $0x14] ss:$28 sps:$4 sm:$0xff]   ;;  %v1279_v2 = vld [vmem:[%s1631_s1 + $0x100] sm:$0xff]  }
  0x17   :  { %v1286_v3 = vld [vmem:[%s1631_s1 + $0x188] sm:$0xff]   ;;  %v1283_v5 = vld [vmem:[%s1632_s0 + $0xb8] ss:$28 sps:$4 sm:$0xff]   ;;  %v1287_v8 = vld [vmem:[%s1631_s1 + $0x180] sm:$0xff]  }
  0x18   :  { %1062 = vmatpush3.bf16.msra.mxu0 %v1230_v23  ;;  %v1280_v4 = vld [vmem:[%s1632_s0 + $0x10] ss:$28 sps:$4 sm:$0xff]   ;;  %v1290_v7 = vld [vmem:[%s1632_s0 + $0x18] ss:$28 sps:$4 sm:$0xff]   ;;  %v150_v9 = vld [vmem:[%s1633_s2] sm:$0xff] }
  0x19   :  { %1102 = vmatpush3.bf16.msra.mxu1 %v1231_v24  ;;  %1063 = vmatprep.subr.bf16.mxu0 %v1232_v25  ;;  %v1288_v6 = vld [vmem:[%s1632_s0 + $0x4c] ss:$28 sps:$4 sm:$0xff]   ;;  %v152_v10 = vld [vmem:[%s1633_s2 + $0x10] sm:$0xff]  ;;  %v1293_v14 = vld [vmem:[%s1632_s0 + $0x84] ss:$28 sps:$4 sm:$0xff]  }
  0x1a   :  { %1103 = vmatprep.subr.bf16.mxu1 %v1233_v26  ;;  %160 = vperm.xlu0 %1206, %v150_v9   ;;  %v1291_v11 = vld [vmem:[%s1632_s0 + $0x48] ss:$28 sps:$4 sm:$0xff]   ;;  %v1292_v13 = vld [vmem:[%s1632_s0 + $0x50] ss:$28 sps:$4 sm:$0xff]   ;;  %v153_v15 = vld [vmem:[%s1633_s2 + $0x18] sm:$0xff] }
  0x1b   :  { %v151_v12 = vld [vmem:[%s1633_s2 + $0x8] sm:$0xff]  ;;  %170 = vperm.xlu1 %1207, %v152_v10   ;;  %v154_v17 = vld [vmem:[%s1633_s2 + $0x20] sm:$0xff]  ;;  %v156_v20 = vld [vmem:[%s1633_s2 + $0x30] sm:$0xff] }
  0x1c   :  { %1064 = vmatpush3.bf16.msra.mxu0 %v1234_v27  ;;  %v1295_v16 = vld [vmem:[%s1632_s0 + $0x88] ss:$28 sps:$4 sm:$0xff]   ;;  %v1296_v19 = vld [vmem:[%s1632_s0 + $0x80] ss:$28 sps:$4 sm:$0xff]  }
  0x1d   :  { %1104 = vmatpush3.bf16.msra.mxu1 %v1235_v28  ;;  %1065 = vmatprep.subr.bf16.mxu0 %v1236_v29  ;;  %v155_v18 = vld [vmem:[%s1633_s2 + $0x28] sm:$0xff]  ;;  %v1297_v21 = vld [vmem:[%s1632_s0 + $0xc0] ss:$28 sps:$4 sm:$0xff]  }
  0x1e   :  { %1105 = vmatprep.subr.bf16.mxu1 %v1237_v30  ;;  %165 = vperm.xlu0 %1206, %v151_v12   ;;  %v157_v22 = vld [vmem:[%s1633_s2 + $0x38] sm:$0xff] }
  0x1f   :  { %175 = vperm.xlu1 %1207, %v153_v15  }
  0x20   :  { %1066 = vmatpush3.bf16.msra.mxu0 %v1238_v31 }
  0x21   :  { %1106 = vmatpush3.bf16.msra.mxu1 %v1239_v32  ;;  %1131 = vmatprep.subr.bf16.mxu0 %v1246_v37 }
  0x22   :  { %1189 = vmatprep.subr.bf16.mxu1 %v1246_v37  ;;  %180 = vperm.xlu0 %1206, %v154_v17  }
  0x23   :  { %684 = vmatmul.mubr.bf16.vlgmr.msra.gmra.mxu0 %v1240_v33  ;;  %185 = vperm.xlu1 %1207, %v155_v18  }
  0x24   :  { %749 = vmatmul.mubr.bf16.vlgmr.msra.gmra.mxu1 %v1243_v35  ;;  %1132 = vmatpush3.bf16.msra.mxu0 %v1247_v38 }
  0x25   :  { %1197 = vmatpush3.bf16.msra.mxu1 %v1247_v38  ;;  %1133 = vmatprep.subr.bf16.mxu0 %v1248_v39 }
  0x26   :  { %1190 = vmatprep.subr.bf16.mxu1 %v1248_v39  ;;  %691 = vmatprep.mubr.bf16.mxu0 %v1250_v41 }
  0x27   :  { %756 = vmatprep.mubr.bf16.mxu1 %v1252_v42  ;;  %190 = vperm.xlu0 %1206, %v156_v20  }
  0x28   :  { %1134 = vmatpush3.bf16.msra.mxu0 %v1249_v40  ;;  %195 = vperm.xlu1 %1207, %v157_v22  }
  0x29   :  { %1198 = vmatpush3.bf16.msra.mxu1 %v1249_v40  ;;  %1135 = vmatprep.subr.bf16.mxu0 %v1256_v45 }
  0x2a   :  { %1191 = vmatprep.subr.bf16.mxu1 %v1256_v45 }
  0x2b   :  { %692 = vmatmul.mubr.bf16.gmra.mxu0 %v1254_v43 }
  0x2c   :  { %757 = vmatmul.mubr.bf16.gmra.mxu1 %v1255_v44  ;;  %1136 = vmatpush3.bf16.msra.mxu0 %v1257_v46 }
  0x2d   :  { %1199 = vmatpush3.bf16.msra.mxu1 %v1257_v46  ;;  %1137 = vmatprep.subr.bf16.mxu0 %v1258_v47 }
  0x2e   :  { %1192 = vmatprep.subr.bf16.mxu1 %v1258_v47  ;;  %699 = vmatprep.mubr.bf16.mxu0 %v1260_v49 }
  0x2f   :  { %764 = vmatprep.mubr.bf16.mxu1 %v1262_v50 }
  0x30   :  { %1138 = vmatpush3.bf16.msra.mxu0 %v1259_v48 }
  0x31   :  { %1200 = vmatpush3.bf16.msra.mxu1 %v1259_v48  ;;  %1139 = vmatprep.subr.bf16.mxu0 %v1266_v52 }
  0x32   :  { %1193 = vmatprep.subr.bf16.mxu1 %v1266_v52 }
  0x33   :  { %700 = vmatmul.mubr.bf16.gmra.mxu0 %v1264_v51 }
  0x34   :  { %765 = vmatmul.mubr.bf16.gmra.mxu1 %v1265_v53  ;;  %1140 = vmatpush3.bf16.msra.mxu0 %v1267_v54 }
  0x35   :  { %707 = vmatprep.mubr.bf16.mxu0 %v1270_v56  ;;  %1201 = vmatpush3.bf16.msra.mxu1 %v1267_v54 }
  0x36   :  { %1141 = vmatprep.subr.bf16.mxu0 %v1268_v55  ;;  %1194 = vmatprep.subr.bf16.mxu1 %v1268_v55 }
  0x37   :  { %772 = vmatprep.mubr.bf16.mxu1 %v1272_v57 }
  0x38   :  { %1142 = vmatpush3.bf16.msra.mxu0 %v1269_v58 }
  0x39   :  { %1202 = vmatpush3.bf16.msra.mxu1 %v1269_v58  ;;  %1143 = vmatprep.subr.bf16.mxu0 %v1276_v59 }
  0x3a   :  { %1195 = vmatprep.subr.bf16.mxu1 %v1276_v59 }
  0x3b   :  { %708 = vmatmul.mubr.bf16.gmra.mxu0 %v1274_v60 }
  0x3c   :  { %773 = vmatmul.mubr.bf16.gmra.mxu1 %v1275_v61  ;;  %813 = vmatprep.mubr.bf16.mxu0 %v1282_v0 }
  0x3d   :  { %1144 = vmatpush3.bf16.msra.mxu0 %v1277_v62  ;;  %1203 = vmatpush3.bf16.msra.mxu1 %v1277_v62 }
  0x3e   :  { %1145 = vmatprep.subr.bf16.mxu0 %v1278_v63  ;;  %1196 = vmatprep.subr.bf16.mxu1 %v1278_v63 }
  0x3f   :  { %837 = vmatprep.mubr.bf16.mxu1 %v1285_v1 }
  0x41   :  { %1146 = vmatpush3.bf16.msra.mxu0 %v1279_v2  ;;  %1204 = vmatpush3.bf16.msra.mxu1 %v1279_v2 }
  0x42   :  { %1177 = vmatprep.subr.bf16.mxu1 %v1286_v3 }
  0x44   :  { %814 = vmatmul.mubr.bf16.vlgmr.msra.gmra.mxu0 %v1280_v4  ;;  %838 = vmatmul.mubr.bf16.vlgmr.msra.gmra.mxu1 %v1283_v5 }
  0x45   :  { %821 = vmatprep.mubr.bf16.mxu0 %v1288_v6  ;;  %1178 = vmatpush3.bf16.msra.mxu1 %v1286_v3 }
  0x46   :  { %1181 = vmatprep.mubr.msk.bf16.mxu1 %vm638_vm0, %v1290_v7  ;;  %1179 = vmatprep.subr.bf16.mxu1 %v1287_v8 }
  0x49   :  { %1180 = vmatpush3.bf16.msra.mxu1 %v1287_v8 }
  0x4c   :  { %822 = vmatmul.mubr.bf16.gmra.mxu0 %v1291_v11  ;;  %1182 = vmatmul.mubr.msk.bf16.vlgmr.msra.gmra.mxu1 %vm638_vm0, %v1292_v13 }
  0x4d   :  { %829 = vmatprep.mubr.bf16.mxu0 %v1293_v14  ;;  %1185 = vmatprep.mubr.msk.bf16.mxu1 %vm638_vm0, %v1295_v16 }
  0x54   :  { %830 = vmatmul.mubr.bf16.gmra.mxu0 %v1296_v19  ;;  %1186 = vmatmul.mubr.msk.bf16.gmra.mxu1 %vm638_vm0, %v1297_v21 }
  0x95   :  { %v161_v54 = vpop.permute.xlu0 %160 }
  0x96   :  { %v171_v57 = vpop.permute.xlu1 %170 }
  0x99   :  { %v166_v2 = vpop.permute.xlu0 %165 }
  0x9a   :  { %v176_v6 = vpop.permute.xlu1 %175 }
  0x9d   :  { %v181_v15 = vpop.permute.xlu0 %180 }
  0x9e   :  { %v186_v20 = vpop.permute.xlu1 %185 }
  0xe3   :  { %v1067_v23 = vpop.f32.mrf.mxu0 }
  0xe4   :  { %v1107_v24 = vpop.f32.mrf.mxu1 }
  0xe5   :  { %v1068_v25 = vpop.f32.mrf.mxu0 }
  0xe6   :  { %v1108_v26 = vpop.f32.mrf.mxu1  ;;  %v1069_v56 = vadd.f32 %v1068_v25, %v1067_v23 }
  0xe7   :  { %v1070_v27 = vpop.f32.mrf.mxu0  ;;  %v1109_v0 = vadd.f32 %v1108_v26, %v1107_v24 }
  0xe8   :  { %v1110_v28 = vpop.f32.mrf.mxu1  ;;  %v686_v1 = vadd.f32 %v1069_v56, %v161_v54  ;;  %v196_v56 = vpop.permute.xlu1 %195 }
  0xe9   :  { %v1071_v29 = vpop.f32.mrf.mxu0 }
  0xea   :  { %v1111_v30 = vpop.f32.mrf.mxu1  ;;  %v1072_v61 = vadd.f32 %v1071_v29, %v1070_v27  ;;  %v751_v13 = vadd.f32 %v1109_v0, %v686_v1  ;;  %v935_v0 = vld [vmem:[%s1634_s3] sm:$0xff] }
  0xeb   :  { %v1073_v31 = vpop.f32.mrf.mxu0  ;;  %v1112_v17 = vadd.f32 %v1111_v30, %v1110_v28 }
  0xec   :  { %v1113_v32 = vpop.f32.mrf.mxu1  ;;  %v689_v9 = vadd.f32 %v1072_v61, %v166_v2 }
  0xed   :  { %v1074_v33 = vpop.f32.mrf.mxu0 }
  0xee   :  { %v1114_v34 = vpop.f32.mrf.mxu1  ;;  %v1075_v62 = vadd.f32 %v1074_v33, %v1073_v31  ;;  %v754_v24 = vadd.f32 %v1112_v17, %v689_v9 }
  0xef   :  { %v1076_v35 = vpop.f32.mrf.mxu0  ;;  %v1115_v10 = vadd.f32 %v1114_v34, %v1113_v32  ;;  %v191_v34 = vpop.permute.xlu0 %190 }
  0xf0   :  { %v1116_v36 = vpop.f32.mrf.mxu1  ;;  %v694_v11 = vadd.f32 %v1075_v62, %v171_v57 }
  0xf1   :  { %v1077_v37 = vpop.f32.mrf.mxu0 }
  0xf2   :  { %v1117_v38 = vpop.f32.mrf.mxu1  ;;  %v1078_v5 = vadd.f32 %v1077_v37, %v1076_v35  ;;  %v759_v25 = vadd.f32 %v1115_v10, %v694_v11 }
  0xf3   :  { %v1079_v39 = vpop.f32.mrf.mxu0  ;;  %v1118_v31 = vadd.f32 %v1117_v38, %v1116_v36 }
  0xf4   :  { %v1119_v40 = vpop.f32.mrf.mxu1  ;;  %v697_v19 = vadd.f32 %v1078_v5, %v176_v6 }
  0xf5   :  { %v1080_v41 = vpop.f32.mrf.mxu0 }
  0xf6   :  { %v1120_v42 = vpop.f32.mrf.mxu1  ;;  %v1081_v14 = vadd.f32 %v1080_v41, %v1079_v39  ;;  %v762_v54 = vadd.f32 %v1118_v31, %v697_v19 }
  0xf7   :  { %v1082_v43 = vpop.f32.mrf.mxu0  ;;  %v1121_v32 = vadd.f32 %v1120_v42, %v1119_v40 }
  0xf8   :  { %v1586_v44 = vpop.f32.mrf.mxu1  ;;  %v702_v33 = vadd.f32 %v1081_v14, %v181_v15 }
  0xf9   :  { %v1083_v45 = vpop.f32.mrf.mxu0 }
  0xfa   :  { %v1588_v46 = vpop.f32.mrf.mxu1  ;;  %v1084_v39 = vadd.f32 %v1083_v45, %v1082_v43  ;;  %v767_v38 = vadd.f32 %v1121_v32, %v702_v33 }
  0xfb   :  { %v1085_v47 = vpop.f32.mrf.mxu0  ;;  %v1124_v40 = vadd.f32 %v1588_v46, %v1586_v44  ;;  %v936_v44 = vld [vmem:[%s1634_s3 + $0x8] sm:$0xff] }
  0xfc   :  { %v1125_v48 = vpop.f32.mrf.mxu1  ;;  %v705_v45 = vadd.f32 %v1084_v39, %v186_v20 }
  0xfd   :  { %v1086_v49 = vpop.f32.mrf.mxu0 }
  0xfe   :  { %v1126_v50 = vpop.f32.mrf.mxu1  ;;  %v1087_v26 = vadd.f32 %v1086_v49, %v1085_v47 }
  0xff   :  { %v1088_v51 = vpop.f32.mrf.mxu0  ;;  %v1127_v61 = vadd.f32 %v1126_v50, %v1125_v48 }
 0x100   :  { %v1590_v52 = vpop.f32.mrf.mxu1  ;;  %v710_v47 = vadd.f32 %v1087_v26, %v191_v34 }
 0x101   :  { %v1089_v53 = vpop.f32.mrf.mxu0 }
 0x102   :  { %v1592_v55 = vpop.f32.mrf.mxu1  ;;  %v1090_v41 = vadd.f32 %v1089_v53, %v1088_v51  ;;  %v775_v5 = vadd.f32 %v1127_v61, %v710_v47 }
 0x103   :  { %v1130_v9 = vadd.f32 %v1592_v55, %v1590_v52 }
 0x104   :  { %v1147_v58 = vpop.f32.mrf.mxu0  ;;  %v1594_v59 = vpop.f32.mrf.mxu1  ;;  %v713_v51 = vadd.f32 %v1090_v41, %v196_v56  ;;  %v940_v56 = vld [vmem:[%s1634_s3 + $0x28] sm:$0xff] }
 0x106   :  { %v1148_v60 = vpop.f32.mrf.mxu0  ;;  %v1166_v63 = vpop.f32.mrf.mxu1 }
 0x107   :  { %v1149_v7 = vadd.f32 %v1148_v60, %v1147_v58  ;;  %v1167_v48 = vadd.f32 %v1166_v63, %v1594_v59 }
 0x108   :  { %v1150_v3 = vpop.f32.mrf.mxu0  ;;  %v1596_v4 = vpop.f32.mrf.mxu1 }
 0x109   :  { %v816_v23 = vadd.f32 %v1149_v7, %v751_v13  ;;  %v840_v19 = vadd.f32 %v1167_v48, %v775_v5 }
 0x10a   :  { %v1151_v8 = vpop.f32.mrf.mxu0  ;;  %v1169_v12 = vpop.f32.mrf.mxu1 }
 0x10b   :  { %v1152_v21 = vadd.f32 %v1151_v8, %v1150_v3  ;;  %v1170_v10 = vadd.f32 %v1169_v12, %v1596_v4  ;;  %v938_v12 = vld [vmem:[%s1634_s3 + $0x18] sm:$0xff] }
 0x10c   :  { %v1153_v16 = vpop.f32.mrf.mxu0  ;;  %v1183_v18 = vpop.f32.mrf.mxu1 }
 0x10d   :  { %v819_v60 = vadd.f32 %v1152_v21, %v754_v24  ;;  %v770_v21 = vadd.f32 %v1124_v40, %v705_v45 }
 0x10e   :  { %v1154_v22 = vpop.f32.mrf.mxu0  ;;  %v880_v29 = vpop.f32.mrf.mxu1 }
 0x10f   :  { %v1155_v27 = vadd.f32 %v1154_v22, %v1153_v16  ;;  %v881_v35 = vadd.f32 %v880_v29, %v816_v23  ;;  %v778_v16 = vadd.f32 %v1130_v9, %v713_v51  ;;  %v939_v29 = vld [vmem:[%s1634_s3 + $0x20] sm:$0xff] }
 0x110   :  { %v1156_v37 = vpop.f32.mrf.mxu0  ;;  %v1184_v30 = vpop.f32.mrf.mxu1 }
 0x111   :  { %v824_v28 = vadd.f32 %v1155_v27, %v759_v25  ;;  %vm911_vm1 = vcmp.ge.f32.partialorder %v881_v35, 0.0  ;;  %v919_v57 = vmul.f32 0.2, %v881_v35  ;;  %v843_v24 = vadd.f32 %v1170_v10, %v778_v16 }
 0x112   :  { %v1157_v58 = vpop.f32.mrf.mxu0  ;;  %v883_v36 = vpop.f32.mrf.mxu1 }
 0x113   :  { %v889_v49 = vadd.f32 %v1183_v18, %v824_v28  ;;  %v1158_v62 = vadd.f32 %v1157_v58, %v1156_v37  ;;  %v884_v42 = vadd.f32 %v883_v36, %v819_v60  ;;  %v927_v53 = vsel %vm911_vm1, %v881_v35, %v919_v57  ;;  %v937_v18 = vld [vmem:[%s1634_s3 + $0x10] sm:$0xff]  ;;  %v942_v36 = vld [vmem:[%s1634_s3 + $0x38] sm:$0xff] }
 0x114   :  { %v1159_v43 = vpop.f32.mrf.mxu0  ;;  %v1187_v2 = vpop.f32.mrf.mxu1  ;;  %v943_v11 = vmul.f32 %v935_v0, %v927_v53  ;;  %v941_v60 = vld [vmem:[%s1634_s3 + $0x30] sm:$0xff] }
 0x115   :  { %v827_v1 = vadd.f32 %v1158_v62, %v762_v54  ;;  %v921_v50 = vmul.f32 0.2, %v889_v49  ;;  %vm912_vm2 = vcmp.ge.f32.partialorder %v884_v42, 0.0  ;;  %v920_v3 = vmul.f32 0.2, %v884_v42 }
 0x116   :  { %v1160_v46 = vpop.f32.mrf.mxu0  ;;  %vm913_vm3 = vcmp.ge.f32.partialorder %v889_v49, 0.0  ;;  %v896_v8 = vpop.f32.mrf.mxu1  ;;  %v905_v23 = vadd.f32 %v1187_v2, %v840_v19 }
 0x117   :  { %v892_v6 = vadd.f32 %v1184_v30, %v827_v1  ;;  %v1161_v7 = vadd.f32 %v1160_v46, %v1159_v43  ;;  %v928_v59 = vsel %vm912_vm2, %v884_v42, %v920_v3  ;;  %v929_v17 = vsel %vm913_vm3, %v889_v49, %v921_v50 }
 0x118   :  { %v1162_v63 = vpop.f32.mrf.mxu0  ;;  %v944_v14 = vmul.f32 %v936_v44, %v928_v59  ;;  %v1188_v55 = vpop.f32.mrf.mxu1  ;;  %v945_v26 = vmul.f32 %v937_v18, %v929_v17  ;;  %v925_v39 = vmul.f32 0.2, %v905_v23  ;;  %vm917_vm6 = vcmp.ge.f32.partialorder %v905_v23, 0.0 }
 0x119   :  { %vm914_vm4 = vcmp.ge.f32.partialorder %v892_v6, 0.0  ;;  %v922_v13 = vmul.f32 0.2, %v892_v6  ;;  %v832_v15 = vadd.f32 %v1161_v7, %v767_v38  ;;  %v908_v31 = vadd.f32 %v1188_v55, %v843_v24 }
 0x11a   :  { %v1163_v20 = vpop.f32.mrf.mxu0  ;;  %v951_v22 = vadd.f32 %v944_v14, %v943_v11  ;;  %v899_v37 = vpop.f32.mrf.mxu1  ;;  %v933_v58 = vsel %vm917_vm6, %v905_v23, %v925_v39 }
 0x11b   :  { %v897_v52 = vadd.f32 %v896_v8, %v832_v15  ;;  %v930_v4 = vsel %vm914_vm4, %v892_v6, %v922_v13  ;;  %v1164_v25 = vadd.f32 %v1163_v20, %v1162_v63  ;;  %v926_v30 = vmul.f32 0.2, %v908_v31 }
 0x11c   :  { %v946_v33 = vmul.f32 %v938_v12, %v930_v4  ;;  %v952_v34 = vadd.f32 %v951_v22, %v945_v26  ;;  %vm918_vm8 = vcmp.ge.f32.partialorder %v908_v31, 0.0  ;;  %v949_v38 = vmul.f32 %v941_v60, %v933_v58 }
 0x11d   :  { %vm915_vm5 = vcmp.ge.f32.partialorder %v897_v52, 0.0  ;;  %v923_v27 = vmul.f32 0.2, %v897_v52  ;;  %v835_v32 = vadd.f32 %v1164_v25, %v770_v21  ;;  %v934_v62 = vsel %vm918_vm8, %v908_v31, %v926_v30 }
 0x11e   :  { %v953_v57 = vadd.f32 %v952_v34, %v946_v33  ;;  %v950_v42 = vmul.f32 %v942_v36, %v934_v62 }
 0x11f   :  { %v931_v35 = vsel %vm915_vm5, %v897_v52, %v923_v27  ;;  %v900_v41 = vadd.f32 %v899_v37, %v835_v32 }
 0x120   :  { %v947_v28 = vmul.f32 %v939_v29, %v931_v35 }
 0x121   :  { %vm916_vm7 = vcmp.ge.f32.partialorder %v900_v41, 0.0  ;;  %v924_v54 = vmul.f32 0.2, %v900_v41 }
 0x122   :  { %v954_v47 = vadd.f32 %v953_v57, %v947_v28 }
 0x123   :  { %v932_v61 = vsel %vm916_vm7, %v900_v41, %v924_v54 }
 0x124   :  { %v948_v49 = vmul.f32 %v940_v56, %v932_v61 }
 0x126   :  { %v955_v40 = vadd.f32 %v954_v47, %v948_v49 }
 0x128   :  { %v956_v43 = vadd.f32 %v955_v40, %v949_v38 }
 0x12a   :  { %v957_v45 = vadd.f32 %v956_v43, %v950_v42 }
 0x12c   :  { %v958_v51 = vrot.slane %v957_v45, 4 }
 0x12e   :  { %v959_v53 = vadd.f32 %v958_v51, %v957_v45 }
 0x130   :  { %v960_v0 = vrot.slane %v959_v53, 2 }
 0x132   :  { %v961_v1 = vadd.f32 %v960_v0, %v959_v53 }
 0x134   :  { %v962_v2 = vrot.slane %v961_v1, 1 }
 0x136   :  { %v963_v48 = vadd.f32 %v962_v2, %v961_v1 }
 0x138   :  { %964 = vst [vmem:[%s1635_s4] sm:$0x1] %v963_v48 }

</bundles_post_ra>
